<compile_context>
chip_gen: v7x
topology: tpu7x:2x2x1
jax: 0.10.0
libtpu: 0.0.40
codegen_flags: <defaults>
</compile_context>

<pallas_src>
import functools

import jax
import jax.numpy as jnp
from jax.experimental import pallas as pl
from jax.experimental.pallas import tpu as pltpu

REPARAM_NOISE = 1e-6
P_LANES = 128  # lane width of the packed parameter blob and of the kernel output


def _actor_kernel(x_ref, p_ref, out_ref, *, in_dim, fc1, fc2, n_actions):
    # Static row offsets inside the packed parameter blob.
    r_w2 = in_dim              # W1 rows: [0, in_dim)
    r_wh = in_dim + fc1        # W2 rows: [in_dim, in_dim+fc1)
    r_b = in_dim + fc1 + fc2   # Whead rows: [r_wh, r_b); bias rows: r_b, r_b+1, r_b+2

    w1 = p_ref[0:r_w2, 0:fc1]          # (in_dim, fc1)
    w2 = p_ref[r_w2:r_wh, 0:fc2]       # (fc1, fc2)
    whd = p_ref[r_wh:r_b, :]           # (fc2, 128)  zero-padded past 2*n_actions
    b1 = p_ref[r_b:r_b + 1, 0:fc1]     # (1, fc1)
    b2 = p_ref[r_b + 1:r_b + 2, 0:fc2] # (1, fc2)
    bhd = p_ref[r_b + 2:r_b + 3, :]    # (1, 128)    zero-padded past 2*n_actions

    x = x_ref[...]
    # fc1 + relu
    h1 = jnp.maximum(jnp.dot(x, w1, preferred_element_type=jnp.float32) + b1, 0.0)
    # fc2 + relu
    h2 = jnp.maximum(jnp.dot(h1, w2, preferred_element_type=jnp.float32) + b2, 0.0)
    # fused mu|sigma head -> lane-dense (block_batch, 128) slab
    head = jnp.dot(h2, whd, preferred_element_type=jnp.float32) + bhd
    # clamp sigma lanes [n_actions, 2*n_actions) to [1e-6, 1]; padding lanes also
    # get clamped (harmless, sliced off in the wrapper), mu lanes pass through.
    col = jax.lax.broadcasted_iota(jnp.int32, head.shape, 1)
    head = jnp.where(col >= n_actions, jnp.clip(head, REPARAM_NOISE, 1.0), head)

    out_ref[...] = head.astype(out_ref.dtype)


def pack_params(w1, b1, w2, b2, wmu, bmu, wsig, bsig):
    """Pack all parameters into one zero-padded (rows, 128) f32 blob.

    Row layout:
      [0, in_dim)                : W1   (in_dim, fc1)
      [in_dim, in_dim+fc1)       : W2   (fc1, fc2)
      [.., .. + fc2)             : Whead = [Wmu | Wsig]  (fc2, 2*n_actions)
      next 3 rows                : b1, b2, bhead = [bmu | bsig]
    Rows padded up to a multiple of 8; lanes padded to 128.
    """
    in_dim, fc1 = w1.shape
    fc2 = w2.shape[1]
    na = wmu.shape[1]
    assert fc1 <= P_LANES and fc2 <= P_LANES and 2 * na <= P_LANES

    whead = jnp.concatenate([wmu, wsig], axis=1)          # (fc2, 2*na)
    bhead = jnp.concatenate([bmu, bsig], axis=1)          # (1, 2*na)

    rows = in_dim + fc1 + fc2 + 3
    rows_padded = pl.cdiv(rows, 8) * 8
    blob = jnp.zeros((rows_padded, P_LANES), jnp.float32)
    r = 0
    blob = blob.at[r:r + in_dim, :fc1].set(w1); r += in_dim
    blob = blob.at[r:r + fc1, :fc2].set(w2); r += fc1
    blob = blob.at[r:r + fc2, :2 * na].set(whead); r += fc2
    blob = blob.at[r, :fc1].set(b1[0]); r += 1
    blob = blob.at[r, :fc2].set(b2[0]); r += 1
    blob = blob.at[r, :2 * na].set(bhead[0]); r += 1
    return blob


@functools.partial(jax.jit, static_argnames=("fc1_dims", "fc2_dims", "n_actions"))
def actor_forward(state, param_blob, *, fc1_dims, fc2_dims, n_actions):
    """One fused Pallas kernel for the whole MLP.

    Small batches (<=128) run as a single grid step with the whole batch in
    VMEM; larger batches are tiled into 128-row blocks over a 'parallel' grid
    axis (lets v7x megacore split the work) with the parameter blob resident.
    """
    batch, in_dim = state.shape
    if batch <= 128:
        bb = batch
        padded = batch
    else:
        bb = 128
        padded = pl.cdiv(batch, bb) * bb
        state = jnp.pad(state, ((0, padded - batch), (0, 0)))

    rows = param_blob.shape[0]
    kernel = functools.partial(_actor_kernel, in_dim=in_dim, fc1=fc1_dims,
                               fc2=fc2_dims, n_actions=n_actions)

    out = pl.pallas_call(
        kernel,
        out_shape=jax.ShapeDtypeStruct((padded, P_LANES), jnp.float32),
        grid=(padded // bb,),
        in_specs=[
            pl.BlockSpec((bb, in_dim), lambda i: (i, 0)),      # state: streamed
            pl.BlockSpec((rows, P_LANES), lambda i: (0, 0)),   # params: resident
        ],
        out_specs=pl.BlockSpec((bb, P_LANES), lambda i: (i, 0)),
        compiler_params=pltpu.CompilerParams(
            dimension_semantics=("parallel",)),
    )(state, param_blob)

    mu = out[:batch, :n_actions]
    sigma = out[:batch, n_actions:2 * n_actions]
    return mu, sigma


def init_linear(key, fan_in, fan_out):
    """Deterministic init mimicking nn.Linear default (uniform +/- 1/sqrt(fan_in)).
    Weight returned in (in, out) layout, bias as (1, out)."""
    kw, kb = jax.random.split(key)
    bound = 1.0 / jnp.sqrt(jnp.float32(fan_in))
    w = jax.random.uniform(kw, (fan_in, fan_out), jnp.float32, -bound, bound)
    b = jax.random.uniform(kb, (1, fan_out), jnp.float32, -bound, bound)
    return w, b


def reference_forward(state, params):
    w1, b1, w2, b2, wmu, bmu, wsig, bsig = params
    h1 = jax.nn.relu(state @ w1 + b1)
    h2 = jax.nn.relu(h1 @ w2 + b2)
    mu = h2 @ wmu + bmu
    sigma = jnp.clip(h2 @ wsig + bsig, REPARAM_NOISE, 1.0)
    return mu, sigma


if __name__ == "__main__":
    # Shapes consistent with the module: input_dims=(8,), fc1=32, fc2=32, n_actions=4.
    batch, input_dim, fc1_dims, fc2_dims, n_actions = 2, 8, 32, 32, 4

    key = jax.random.PRNGKey(0)
    k_state, k1, k2, k3, k4, k_big = jax.random.split(key, 6)

    state = jax.random.normal(k_state, (batch, input_dim), jnp.float32)
    w1, b1 = init_linear(k1, input_dim, fc1_dims)
    w2, b2 = init_linear(k2, fc1_dims, fc2_dims)
    wmu, bmu = init_linear(k3, fc2_dims, n_actions)
    wsig, bsig = init_linear(k4, fc2_dims, n_actions)
    params = (w1, b1, w2, b2, wmu, bmu, wsig, bsig)
    blob = pack_params(*params)

    # Small (per-env-step) batch.
    mu, sigma = actor_forward(state, blob, fc1_dims=fc1_dims,
                              fc2_dims=fc2_dims, n_actions=n_actions)
    mu, sigma = jax.block_until_ready((mu, sigma))

    mu_ref, sigma_ref = reference_forward(state, params)
    assert mu.shape == (batch, n_actions) and sigma.shape == (batch, n_actions)
    assert jnp.allclose(mu, mu_ref, atol=1e-5, rtol=1e-5)
    assert jnp.allclose(sigma, sigma_ref, atol=1e-5, rtol=1e-5)
    assert bool(jnp.all(sigma >= REPARAM_NOISE)) and bool(jnp.all(sigma <= 1.0))

    # Replay-buffer sized batch: exercises the 128-row-block 'parallel' grid path
    # (non-multiple of 128 to also test batch padding).
    big_batch = 300
    big_state = jax.random.normal(k_big, (big_batch, input_dim), jnp.float32)
    mu_b, sigma_b = actor_forward(big_state, blob, fc1_dims=fc1_dims,
                                  fc2_dims=fc2_dims, n_actions=n_actions)
    mu_b, sigma_b = jax.block_until_ready((mu_b, sigma_b))
    mu_br, sigma_br = reference_forward(big_state, params)
    assert mu_b.shape == (big_batch, n_actions) and sigma_b.shape == (big_batch, n_actions)
    assert jnp.allclose(mu_b, mu_br, atol=1e-4, rtol=1e-4)
    assert jnp.allclose(sigma_b, sigma_br, atol=1e-4, rtol=1e-4)

    # TODO(synk): sample_normal / sample_mvnormal (Normal sampling, tanh squash,
    # log-prob) are RNG + distribution ops; only the deterministic forward()
    # hot path is implemented as a kernel.
    print("KERNEL_OK")
</pallas_src>

<mosaic_0001>
module attributes {stable_mosaic.version = 11 : i64} {
  func.func @_actor_kernel(%arg0: i32, %arg1: memref<2x8xf32, #tpu.memory_space<vmem>>, %arg2: memref<80x128xf32, #tpu.memory_space<vmem>>, %arg3: memref<2x128xf32, #tpu.memory_space<vmem>>) attributes {dimension_semantics = [#tpu.dimension_semantics<parallel>], iteration_bounds = array<i64: 1>, scalar_prefetch = 0 : i64, scratch_operands = 0 : i64, tpu.core_type = #tpu.core_type<tc>, window_params = [{transform_indices = @transform_0, window_bounds = array<i64: 2, 8>}, {pipeline_mode = #tpu.pipeline_mode<synchronous>, transform_indices = @transform_1, window_bounds = array<i64: 80, 128>}, {transform_indices = @transform_2, window_bounds = array<i64: 2, 128>}]} {
    %c0 = arith.constant 0 : index
    %c0_0 = arith.constant 0 : index
    %0 = vector.load %arg2[%c0, %c0_0] : memref<80x128xf32, #tpu.memory_space<vmem>>, vector<8x32xf32>
    %c8 = arith.constant 8 : index
    %c0_1 = arith.constant 0 : index
    %1 = vector.load %arg2[%c8, %c0_1] : memref<80x128xf32, #tpu.memory_space<vmem>>, vector<32x32xf32>
    %c40 = arith.constant 40 : index
    %c0_2 = arith.constant 0 : index
    %2 = vector.load %arg2[%c40, %c0_2] : memref<80x128xf32, #tpu.memory_space<vmem>>, vector<32x128xf32>
    %c72 = arith.constant 72 : index
    %c0_3 = arith.constant 0 : index
    %3 = vector.load %arg2[%c72, %c0_3] : memref<80x128xf32, #tpu.memory_space<vmem>>, vector<1x32xf32>
    %c73 = arith.constant 73 : index
    %c0_4 = arith.constant 0 : index
    %4 = vector.load %arg2[%c73, %c0_4] : memref<80x128xf32, #tpu.memory_space<vmem>>, vector<1x32xf32>
    %c74 = arith.constant 74 : index
    %c0_5 = arith.constant 0 : index
    %5 = vector.load %arg2[%c74, %c0_5] : memref<80x128xf32, #tpu.memory_space<vmem>>, vector<1x128xf32>
    %c0_6 = arith.constant 0 : index
    %c0_7 = arith.constant 0 : index
    %6 = vector.load %arg1[%c0_6, %c0_7] : memref<2x8xf32, #tpu.memory_space<vmem>>, vector<2x8xf32>
    %cst = arith.constant dense<0.000000e+00> : vector<2x32xf32>
    %7 = tpu.matmul %6, %0, %cst {dimension_numbers = #tpu.dot_dimension_numbers<[1], [0], [0], [1], [0, 0, 1, 1], [], []>} : vector<2x8xf32>, vector<8x32xf32>, vector<2x32xf32> -> vector<2x32xf32>
    %8 = vector.broadcast %3 : vector<1x32xf32> to vector<2x32xf32>
    %9 = arith.addf %7, %8 : vector<2x32xf32>
    %cst_8 = arith.constant 0.000000e+00 : f32
    %10 = vector.broadcast %cst_8 : f32 to vector<2x32xf32>
    %11 = arith.maximumf %9, %10 : vector<2x32xf32>
    %cst_9 = arith.constant dense<0.000000e+00> : vector<2x32xf32>
    %12 = tpu.matmul %11, %1, %cst_9 {dimension_numbers = #tpu.dot_dimension_numbers<[1], [0], [0], [1], [0, 0, 1, 1], [], []>} : vector<2x32xf32>, vector<32x32xf32>, vector<2x32xf32> -> vector<2x32xf32>
    %13 = vector.broadcast %4 : vector<1x32xf32> to vector<2x32xf32>
    %14 = arith.addf %12, %13 : vector<2x32xf32>
    %cst_10 = arith.constant 0.000000e+00 : f32
    %15 = vector.broadcast %cst_10 : f32 to vector<2x32xf32>
    %16 = arith.maximumf %14, %15 : vector<2x32xf32>
    %cst_11 = arith.constant dense<0.000000e+00> : vector<2x128xf32>
    %17 = tpu.matmul %16, %2, %cst_11 {dimension_numbers = #tpu.dot_dimension_numbers<[1], [0], [0], [1], [0, 0, 1, 1], [], []>} : vector<2x32xf32>, vector<32x128xf32>, vector<2x128xf32> -> vector<2x128xf32>
    %18 = vector.broadcast %5 : vector<1x128xf32> to vector<2x128xf32>
    %19 = arith.addf %17, %18 : vector<2x128xf32>
    %20 = tpu.iota {dimensions = array<i32: 1>} : vector<2x128xi32>
    %c4_i32 = arith.constant 4 : i32
    %21 = vector.broadcast %c4_i32 : i32 to vector<2x128xi32>
    %22 = arith.cmpi sge, %20, %21 : vector<2x128xi32>
    %cst_12 = arith.constant 9.99999997E-7 : f32
    %cst_13 = arith.constant 1.000000e+00 : f32
    %23 = vector.broadcast %cst_12 : f32 to vector<2x128xf32>
    %24 = arith.maximumf %23, %19 : vector<2x128xf32>
    %25 = vector.broadcast %cst_13 : f32 to vector<2x128xf32>
    %26 = arith.minimumf %25, %24 : vector<2x128xf32>
    %27 = arith.select %22, %26, %19 : vector<2x128xi1>, vector<2x128xf32>
    %c0_14 = arith.constant 0 : index
    %c0_15 = arith.constant 0 : index
    %28 = vector.load %arg3[%c0_14, %c0_15] : memref<2x128xf32, #tpu.memory_space<vmem>>, vector<2x128xf32>
    tpu.vector_store %arg3[%c0_14, %c0_15], %27 {strides = array<i32>} : memref<2x128xf32, #tpu.memory_space<vmem>>, vector<2x128xf32>,
    return
  }
  func.func @transform_0(%arg0: i32) -> (i32, i32) {
    %c0_i32 = arith.constant 0 : i32
    %c0_i32_0 = arith.constant 0 : i32
    return %arg0, %c0_i32 : i32, i32
  }
  func.func @transform_1(%arg0: i32) -> (i32, i32) {
    %c0_i32 = arith.constant 0 : i32
    %c0_i32_0 = arith.constant 0 : i32
    %c0_i32_1 = arith.constant 0 : i32
    return %c0_i32, %c0_i32_0 : i32, i32
  }
  func.func @transform_2(%arg0: i32) -> (i32, i32) {
    %c0_i32 = arith.constant 0 : i32
    %c0_i32_0 = arith.constant 0 : i32
    return %arg0, %c0_i32 : i32, i32
  }
}

</mosaic_0001>

<bundles_post_ra>
// kernel: actor_forward.1
= control target key start
LH: loop header
LB: loop body
LE: loop exit
PB: predicated region body
PF: predicated region fallthrough
CT: control target
= control target key end

     0   :  { %7 = vsyncpa [#allocation3], 0  ;;  %s466_s0 = inlined_call_operand.hbm [shape: f32[2,8], index: 0, kind: input, shape index: {}]   ;;  %s467_s1 = inlined_call_operand.hbm [shape: f32[80,128], index: 1, kind: input, shape index: {}]   ;;  %s468_s2 = inlined_call_operand.vmem [shape: f32[2,128], index: 2, kind: output, shape index: {}]  }
   0x1   :  { %8 = vsyncpa [#allocation5], 0  ;;  %s410_s9 = smov [#allocation2]   ;;  %s411_s11 = smov [#allocation4]  }
   0x2   :  { %s15_s10 = sshll.u32 %s410_s9, 4  ;;  %s24_s12 = sshll.u32 %s411_s11, 4  ;;  %s16_s10 = int_to_ptr.vmem [resolvable:$true] %s15_s10  ;;  %s432_s12 = int_to_ptr.vmem [resolvable:$true] %s24_s12 }
   0x3   :  { %s362_s15 = scalar_lea.hbm %s466_s0, 32 }
   0x4   :  { %p363_p0 = scmp.ne.s32.totalorder %s466_s0, %s362_s15  ;;  %p366_p1 = scmp.lt.u32.totalorder %s362_s15, %s466_s0 }
   0x6   :  { %p368_p2 = pnand %p366_p1, %p363_p0 }
   0x8   :  { %371 = shalt.err (!%p368_p2)
}
   0x9   :  { %s372_s20 = scalar_lea.vmem %s16_s10, 32  ;;  %p377_p4 = scmp.lt.s32.totalorder %s16_s10, %s16_s10 }
   0xa   :  { %p373_p3 = scmp.ne.s32.totalorder %s16_s10, %s372_s20  ;;  %p378_p5 = scmp.lt.s32.totalorder %s372_s20, %s372_s20 }
   0xc   :  { %p379_p6 = por %p378_p5, %p377_p4 }
   0xe   :  { %p380_p7 = pnand %p379_p6, %p373_p3 }
  0x10   :  { %383 = shalt.err (!%p380_p7)
}
  0x11   :  { %18 = dma.hbm_to_vmem [thread:$0]  %s466_s0, 32, %s16_s10, [#allocation3]  }
  0x12   :  { %s384_s25 = scalar_lea.hbm %s467_s1, 1280 }
  0x13   :  { %p385_p8 = scmp.ne.s32.totalorder %s467_s1, %s384_s25  ;;  %p388_p9 = scmp.lt.u32.totalorder %s384_s25, %s467_s1 }
  0x15   :  { %p390_p10 = pnand %p388_p9, %p385_p8 }
  0x17   :  { %393 = shalt.err (!%p390_p10)
}
  0x18   :  { %s394_s30 = scalar_lea.vmem %s432_s12, 1280  ;;  %p399_p12 = scmp.lt.s32.totalorder %s432_s12, %s432_s12 }
  0x19   :  { %p395_p11 = scmp.ne.s32.totalorder %s432_s12, %s394_s30  ;;  %p400_p13 = scmp.lt.s32.totalorder %s394_s30, %s394_s30 }
  0x1b   :  { %p401_p0 = por %p400_p13, %p399_p12 }
  0x1d   :  { %p402_p1 = pnand %p401_p0, %p395_p11 }
  0x1f   :  { %405 = shalt.err (!%p402_p1)
}
  0x20   :  { %s412_s0 = smov 128   ;;  %s413_s3 = smov 8  }
  0x21   :  { %30 = dma.hbm_to_vmem [thread:$0]  %s467_s1, 1280, %s432_s12, [#allocation5], %s412_s0, %s412_s0, %s413_s3  }
  0x22   :  { %406 = dma.done.wait [#allocation3], 32  }
  0x23   :  { %407 = vsyncadd [#allocation3], 4294967264 }
  0x24   :  { %408 = dma.done.wait [#allocation5], 1280  }
  0x25   :  { %409 = vsyncadd [#allocation5], 4294966016  ;;  %v414_v0 = vmov 0.0   ;;  %vm415_vm0 = vmmov 0   ;;  %v416_v1 = vmov 0.0|0.0   ;;  %vm54_vm1 = vcmask 64512  }
  0x26   :  { %316 = vmatprep.subr.mxu0 %v414_v0  ;;  %318 = vmatprep.mubr.msk.f32.mxu0 %vm415_vm0, %v414_v0  ;;  %v37_v2 = vld [vmem:[#allocation4] sm:$0xff]  ;;  %v49_v3 = vld [vmem:[#allocation2] sm:$0x3]  ;;  %v38_v4 = vld [vmem:[#allocation4 + $0x8] sm:$0xff]  ;;  %vm133_vm2 = vcmask 261120   ;;  %v285_v26 = vlaneseq }
  0x27   :  { %343 = vmatprep.subr.bf16.mxu1 %v416_v1  ;;  %329 = vmatprep.mubr.msk.f32.mxu1 %vm415_vm0, %v414_v0  ;;  %v39_v5 = vld [vmem:[#allocation4 + $0x10] sm:$0xff]  ;;  %v40_v7 = vld [vmem:[#allocation4 + $0x18] sm:$0xff]  ;;  %v41_v8 = vld [vmem:[#allocation4 + $0x20] sm:$0xff] }
  0x28   :  { %317 = vmatpush3.msra.mxu0 %v37_v2  ;;  %v344_v6 = vpack.c.bf16 %v39_v5, %v38_v4  ;;  %v347_v9 = vpack.c.bf16 %v41_v8, %v40_v7  ;;  %v42_v10 = vld [vmem:[#allocation4 + $0x28] sm:$0xff]  ;;  %v43_v11 = vld [vmem:[#allocation4 + $0x30] sm:$0xff]  ;;  %v44_v18 = vld [vmem:[#allocation4 + $0x38] sm:$0xff]  ;;  %v286_v29 = vand.u32 127, %v285_v26 }
  0x29   :  { %319 = vmatmul.mubr.msk.f32.vlgmr.msra.gmra.mrb[0].mxu0 %vm54_vm1, %v49_v3  ;;  %349 = vmatprep.subr.bf16.mxu0 %v416_v1  ;;  %v350_v12 = vpack.c.bf16 %v43_v11, %v42_v10  ;;  %v298_v13 = vld [vmem:[#allocation4 + $0x48] ss:$0 sm:$0xff]  ;;  %v45_v19 = vld [vmem:[#allocation4 + $0x40] sm:$0xff]  ;;  %v300_v21 = vld [vmem:[#allocation4 + $0x49] ss:$0 sm:$0xff] }
  0x2a   :  { %340 = vmatprep.mubr.msk.f32.mxu0 %vm415_vm0, %v414_v0  ;;  %345 = vmatpush3.bf16.msra.mxu1 %v344_v6  ;;  %v353_v20 = vpack.c.bf16 %v45_v19, %v44_v18  ;;  %v302_v27 = vld [vmem:[#allocation4 + $0x4a] ss:$0 sm:$0xff]  ;;  %vm287_vm3 = vcmp.ge.s32.totalorder %v286_v29, 4 }
  0x2b   :  { %346 = vmatprep.subr.bf16.mxu1 %v416_v1  ;;  %351 = vmatpush3.bf16.msra.mxu0 %v350_v12 }
  0x2c   :  { %352 = vmatprep.subr.bf16.mxu0 %v416_v1 }
  0x2e   :  { %348 = vmatpush3.bf16.msra.mxu1 %v347_v9 }
  0x2f   :  { %354 = vmatpush3.bf16.msra.mxu0 %v353_v20 }
  0xfc   :  { %v124_v14 = vpop.f32.mrb[0].mxu0 }
  0xfd   :  { %v125_v15 = vadd.f32 %v298_v13, %v124_v14  ;;  %v320_v16 = vpop.f32.mrb[1].mxu0 }
  0xff   :  { %v128_v17 = vmax.f32 %v125_v15, 0.0 }
 0x101   :  { %330 = vmatmul.mubr.msk.f32.vlgmr.msra.gmra.mrb[0].mxu1 %vm133_vm2, %v128_v17 }
 0x1d4   :  { %v203_v22 = vpop.f32.mrb[0].mxu1 }
 0x1d5   :  { %v204_v23 = vadd.f32 %v300_v21, %v203_v22  ;;  %v331_v24 = vpop.f32.mrb[1].mxu1 }
 0x1d7   :  { %v207_v25 = vmax.f32 %v204_v23, 0.0 }
 0x1d9   :  { %341 = vmatmul.mubr.msk.f32.vlgmr.msra.gmra.mrb[2].mxu0 %vm133_vm2, %v207_v25 }
 0x2ac   :  { %v281_v28 = vpop.f32.mrb[2].mxu0 }
 0x2ad   :  { %v282_v30 = vadd.f32 %v302_v27, %v281_v28  ;;  %v342_v31 = vpop.f32.mrb[3].mxu0 }
 0x2af   :  { %v288_v32 = vmax.f32 %v282_v30, 1e-06 }
 0x2b1   :  { %v289_v33 = vmin.f32 %v288_v32, 1.0 }
 0x2b3   :  { %v290_v34 = vsel %vm287_vm3, %v289_v33, %v282_v30 }
 0x2b4   :  { %291 = vst [vmem:[%s468_s2] sm:$0x3] %v290_v34 }
 0x2b5   :  { %296 = vsyncpa [#allocation3], 1 }
 0x2b6   :  { %297 = vsyncpa [#allocation5], 1 }

</bundles_post_ra>
